<compile_context>
chip_gen: v6e
topology: v6e:2x2x1
jax: 0.10.0
libtpu: 0.0.40
codegen_flags: <defaults>
</compile_context>

<pallas_src>
import jax
import jax.numpy as jnp
from jax.experimental import pallas as pl
from jax.experimental.pallas import tpu as pltpu

_TARGET_TILE_BYTES = 2 * 1024 * 1024  # ~2 MiB payload per grid step


def _spatial_layout(hw, itemsize):
    """Pick (L, R_total, tile_R): HW -> (R_total, L) with L lane-dense, tile_R | R_total."""
    lane = next((c for c in (1024, 512, 256, 128) if hw % c == 0), None)
    if lane is None:
        # Small / oddly sized images: one full-extent row block (still correct).
        return hw, 1, 1
    r_total = hw // lane
    max_rows = max(8, _TARGET_TILE_BYTES // (itemsize * lane))
    if r_total <= max_rows:
        return lane, r_total, r_total
    # Largest multiple-of-8 divisor of r_total not exceeding max_rows
    # (divisor => no partial/masked last block).
    tile_r = r_total
    d = 8
    while d <= max_rows:
        if r_total % d == 0:
            tile_r = d
        d += 8
    return lane, r_total, tile_r


def _normalize_kernel(mean_ref, inv_std_ref, x_ref, o_ref):
    """x_ref/o_ref: (1, 1, tile_R, L) VMEM block; mean/inv_std: (C,) scalars in SMEM."""
    c = pl.program_id(1)                       # channel index from the grid
    m = mean_ref[c]
    s = inv_std_ref[c]
    o_ref[...] = ((x_ref[...] - m) * s).astype(o_ref.dtype)


def normalization(img, mean, std):
    """img: (B, C, H, W); mean/std: (C,). Returns (img - mean) / std per channel."""
    B, C, H, W = img.shape
    HW = H * W
    itemsize = jnp.dtype(img.dtype).itemsize

    L, R_total, tile_R = _spatial_layout(HW, itemsize)
    x = img.reshape(B, C, R_total, L)          # free reshape -> lane-dense last dim
    grid = (B, C, R_total // tile_R)           # all axes independent (parallel)

    mean = mean.astype(img.dtype)
    inv_std = (1.0 / std).astype(img.dtype)    # 3 scalars; <=1 ulp vs true divide

    out = pl.pallas_call(
        _normalize_kernel,
        out_shape=jax.ShapeDtypeStruct((B, C, R_total, L), img.dtype),
        grid=grid,
        in_specs=[
            pl.BlockSpec(memory_space=pltpu.MemorySpace.SMEM),           # mean (C,)
            pl.BlockSpec(memory_space=pltpu.MemorySpace.SMEM),           # 1/std (C,)
            pl.BlockSpec((1, 1, tile_R, L), lambda b, c, s: (b, c, s, 0)),
        ],
        out_specs=pl.BlockSpec((1, 1, tile_R, L), lambda b, c, s: (b, c, s, 0)),
        compiler_params=pltpu.CompilerParams(
            dimension_semantics=("parallel", "parallel", "parallel")),
        cost_estimate=pl.CostEstimate(
            flops=2 * B * C * HW,
            transcendentals=0,
            bytes_accessed=2 * B * C * HW * itemsize),
    )(mean, inv_std, x)

    return out.reshape(B, C, H, W)


def _reference(img, mean, std):
    """Pure-JAX reference mirroring the PyTorch forward."""
    return (img - mean[None, :, None, None]) / std[None, :, None, None]


if __name__ == "__main__":
    key = jax.random.PRNGKey(0)

    B, C, H, W = 2, 3, 16, 16
    img = jax.random.uniform(key, (B, C, H, W), jnp.float32)   # image-like values in [0, 1)
    mean = jnp.array([0.485, 0.456, 0.406], jnp.float32)
    std = jnp.array([0.229, 0.224, 0.225], jnp.float32)

    out = normalization(img, mean, std)
    out = jax.block_until_ready(out)

    ref = _reference(img, mean, std)
    assert out.shape == img.shape
    assert jnp.allclose(out, ref, atol=1e-5, rtol=1e-5), "mismatch vs JAX reference"

    print("KERNEL_OK")
</pallas_src>

<mosaic_0001>
module attributes {stable_mosaic.version = 11 : i64} {
  func.func @_normalize_kernel(%arg0: i32, %arg1: i32, %arg2: i32, %arg3: memref<3xf32, #tpu.memory_space<smem>>, %arg4: memref<3xf32, #tpu.memory_space<smem>>, %arg5: memref<1x1x1x256xf32, #tpu.memory_space<vmem>>, %arg6: memref<1x1x1x256xf32, #tpu.memory_space<vmem>>) attributes {dimension_semantics = [#tpu.dimension_semantics<parallel>, #tpu.dimension_semantics<parallel>, #tpu.dimension_semantics<parallel>], iteration_bounds = array<i64: 2, 3, 1>, scalar_prefetch = 0 : i64, scratch_operands = 0 : i64, tpu.core_type = #tpu.core_type<tc>, window_params = [{transform_indices = @transform_0, window_bounds = array<i64: 3>}, {transform_indices = @transform_1, window_bounds = array<i64: 3>}, {transform_indices = @transform_2, window_bounds = array<i64: 1, 1, 1, 256>}, {transform_indices = @transform_3, window_bounds = array<i64: 1, 1, 1, 256>}]} {
    %0 = arith.index_cast %arg1 : i32 to index
    %1 = memref.load %arg3[%0] : memref<3xf32, #tpu.memory_space<smem>>
    %2 = arith.index_cast %arg1 : i32 to index
    %3 = memref.load %arg4[%2] : memref<3xf32, #tpu.memory_space<smem>>
    %c0 = arith.constant 0 : index
    %c0_0 = arith.constant 0 : index
    %c0_1 = arith.constant 0 : index
    %c0_2 = arith.constant 0 : index
    %4 = vector.load %arg5[%c0, %c0_0, %c0_1, %c0_2] : memref<1x1x1x256xf32, #tpu.memory_space<vmem>>, vector<1x1x1x256xf32>
    %5 = vector.broadcast %1 : f32 to vector<1x1x1x256xf32>
    %6 = arith.subf %4, %5 : vector<1x1x1x256xf32>
    %7 = vector.broadcast %3 : f32 to vector<1x1x1x256xf32>
    %8 = arith.mulf %6, %7 : vector<1x1x1x256xf32>
    %c0_3 = arith.constant 0 : index
    %c0_4 = arith.constant 0 : index
    %c0_5 = arith.constant 0 : index
    %c0_6 = arith.constant 0 : index
    %9 = vector.load %arg6[%c0_3, %c0_4, %c0_5, %c0_6] : memref<1x1x1x256xf32, #tpu.memory_space<vmem>>, vector<1x1x1x256xf32>
    tpu.vector_store %arg6[%c0_3, %c0_4, %c0_5, %c0_6], %8 {strides = array<i32>} : memref<1x1x1x256xf32, #tpu.memory_space<vmem>>, vector<1x1x1x256xf32>,
    return
  }
  func.func @transform_0(%arg0: i32, %arg1: i32, %arg2: i32) -> i32 {
    %c0_i32 = arith.constant 0 : i32
    %c0_i32_0 = arith.constant 0 : i32
    return %c0_i32 : i32
  }
  func.func @transform_1(%arg0: i32, %arg1: i32, %arg2: i32) -> i32 {
    %c0_i32 = arith.constant 0 : i32
    %c0_i32_0 = arith.constant 0 : i32
    return %c0_i32 : i32
  }
  func.func @transform_2(%arg0: i32, %arg1: i32, %arg2: i32) -> (i32, i32, i32, i32) {
    %c0_i32 = arith.constant 0 : i32
    %c0_i32_0 = arith.constant 0 : i32
    return %arg0, %arg1, %arg2, %c0_i32 : i32, i32, i32, i32
  }
  func.func @transform_3(%arg0: i32, %arg1: i32, %arg2: i32) -> (i32, i32, i32, i32) {
    %c0_i32 = arith.constant 0 : i32
    %c0_i32_0 = arith.constant 0 : i32
    return %arg0, %arg1, %arg2, %c0_i32 : i32, i32, i32, i32
  }
}

</mosaic_0001>

<bundles_post_ra>
// kernel: tpu_custom_call.1
= control target key start
LH: loop header
LB: loop body
LE: loop exit
PB: predicated region body
PF: predicated region fallthrough
CT: control target
= control target key end

     0   :  { %s902_s0 = inlined_call_operand.hbm [shape: f32[3], index: 0, kind: input, shape index: {}]   ;;  %s903_s1 = inlined_call_operand.vmem [shape: f32[3], index: 1, kind: input, shape index: {}]   ;;  %s904_s2 = inlined_call_operand.hbm [shape: f32[2,3,1,256], index: 2, kind: input, shape index: {}]   ;;  %s905_s3 = inlined_call_operand.hbm [shape: f32[2,3,1,256], index: 3, kind: output, shape index: {}]  }
   0x1   :  { %909 = sst [smem:[#allocation17_spill]] %s902_s0 }
   0x2   :  { %910 = sst [smem:[#allocation18_spill]] %s903_s1 }
   0x3   :  { %8 = vsyncpa [#allocation5], 0 }
   0x4   :  { %9 = vsyncpa [#allocation6], 0 }
   0x5   :  { %10 = vsyncpa [#allocation3], 0 }
   0x6   :  { %12 = vsyncpa [#allocation3 + $0x1], 0 }
   0x7   :  { %13 = vsyncpa [#allocation4], 0 }
   0x8   :  { %15 = vsyncpa [#allocation4 + $0x1], 0  ;;  %s696_s12 = smov 0   ;;  %s698_s13 = smov 0  }
   0x9   :  { %s700_s14 = smov 0   ;;  %s702_s15 = smov 0  }
   0xa   :  { %s704_s16 = smov 0   ;;  %s706_s17 = smov 0  }
   0xb   :  { %s708_s18 = smov 0   ;;  %s710_s19 = smov 0  }
   0xc LB: > { %911 = sst [smem:[#allocation14_spill]] %s642_s12  ;;  %s392_s20 = sadd.s32 4294967295, %s670_s19   ;;  %s670_s19 = sphi %s710_s19, %s21_s19   ;;  %s666_s18 = sphi %s708_s18, %s934_s18   ;;  %s662_s17 = sphi %s706_s17, %s933_s17   ;;  %s658_s16 = sphi %s704_s16, %s932_s16   ;;  %s654_s15 = sphi %s702_s15, %s931_s15   ;;  %s650_s14 = sphi %s700_s14, %s930_s14   ;;  %s646_s13 = sphi %s698_s13, %s929_s13   ;;  %s642_s12 = sphi %s696_s12, %s928_s12  }
   0xd   : > { %s393_s21 = sadd.s32 4294967294, %s670_s19   ;;  %p106_p0 = scmp.ne.s32.totalorder %s646_s13, %s642_s12 }
   0xe   : > { %p740_p1 = scmp.eq.s32.totalorder %s392_s20, 0  ;;  %p744_p2 = scmp.eq.s32.totalorder %s392_s20, 5 }
   0xf   : > { %p140_p3 = scmp.eq.s32.totalorder %s393_s21, 5  ;;  %p394_p5 = scmp.ge.s32.totalorder %s670_s19, 1 }
  0x10   : > { %p750_p4 = por %p740_p1, %p106_p0  ;;  %p147_p7 = scmp.lt.s32.totalorder %s670_s19, 7 }
  0x11   : > { %p755_p6 = por %p140_p3, %p106_p0  ;;  %s918_s1 = sld [smem:[#allocation18_spill]] }
  0x12   : > { %p760_p8 = pnand %p394_p5, %p147_p7  ;;  %s672_s4 = smov [#allocation2]  }
  0x13   : > { %s915_s25 = scalar_select %p755_p6, 1, 0 }
  0x14   : > { %p425_p9 = pneg %p760_p8  ;;  %s920_s0 = sld [smem:[#allocation17_spill]] }
  0x15   : > { %916 = sst [smem:[#allocation15_spill]] %s915_s25 }
  0x16   : > { %p771_p10 = pnand %p425_p9, %p740_p1 }
  0x17   : > { %s169_s29 = sshll.u32 %s918_s1, 4  ;;  %s170_s29 = int_to_ptr.vmem [resolvable:$true] %s169_s29 }
  0x18   : > { %s523_s7 = scalar_lea.vmem %s170_s29, 16  ;;  %p525_p12 = pneg %p771_p10 }
  0x19   : > { %p524_p11 = scmp.ne.s32.totalorder %s170_s29, %s523_s7  ;;  %p531_p3 = scmp.lt.s32.totalorder %s170_s29, %s170_s29 }
  0x1a   : > { %428 = dma.hbm_to_smem (!%p771_p10), %s920_s0, 16, %s672_s4, [#allocation5]  }
  0x1b   : > { %p526_p13 = pnand %p525_p12, %p524_p11  ;;  %p532_p5 = scmp.lt.s32.totalorder %s523_s7, %s523_s7 }
  0x1d   : > { %p527_p0 = pneg %p526_p13  ;;  %p533_p7 = por %p532_p5, %p531_p3 }
  0x1f   : > { %p534_p9 = pnand %p533_p7, %p527_p0 }
  0x21   : > { %537 = shalt.err (!%p534_p9)
}
  0x22   : > { %s673_s8 = smov [#allocation7]   ;;  %s36_s9 = sadd.s32 1, %s662_s17 }
  0x23   : > { %431 = dma.vmem_to_smem (!%p771_p10), %s170_s29, 16, %s673_s8, [#allocation6]  }
  0x24   : > { %s40_s10 = sadd.s32 1, %s666_s18  ;;  %p38_p11 = scmp.ge.s32.totalorder %s36_s9, 3 }
  0x25   : > { %s93_s11 = sadd.s32 1, %s650_s14  ;;  %p100_p12 = scmp.ne.s32.totalorder %s650_s14, %s646_s13 }
  0x26   : > { %p101_p13 = scmp.eq.s32.totalorder %s670_s19, 0  ;;  %s936_s9 = smov (%p38_p11, %s36_s9), 0 }
  0x27   : > { %921 = sst [smem:[#allocation16_spill]] %s936_s9  ;;  %s938_s10 = smov (!%p38_p11, %s40_s10), %s666_s18 }
  0x28   : > { %s87_s20 = ssub.s32 %s662_s17, %s936_s9  ;;  %p795_p0 = por %p101_p13, %p100_p12 }
  0x29   : > { %p42_p10 = scmp.ge.s32.totalorder %s938_s10, 2  ;;  %p801_p3 = por %p744_p2, %p100_p12 }
  0x2a   : > { %p442_p5 = scmp.lt.s32.totalorder %s670_s19, 6  ;;  %s180_s28 = sand.u32 1, %s650_s14  }
  0x2b   : > { %s940_s10 = smov (%p42_p10, %s938_s10), 0  ;;  %s398_s29 = sshll.u32 %s180_s28, 1 }
  0x2c   : > { %s86_s30 = ssub.s32 %s666_s18, %s940_s10  ;;  %s399_s5 = sshll.u32 %s662_s17, 1 }
  0x2d   : > { %s88_s4 = sor.u32 %s87_s20, %s86_s30  ;;  %s411_s6 = smul.u32 6, %s666_s18 }
  0x2e   : > { %p91_p7 = scmp.eq.s32.totalorder %s88_s4, 0  ;;  %s184_s7 = scalar_lea.vmem [#allocation8], %s398_s29 }
  0x2f   : > { %s196_s8 = sshll.u32 %s184_s7, 4  ;;  %p815_p9 = pnand %p442_p5, %p795_p0  ;;  %s197_s8 = int_to_ptr.vmem [resolvable:$true] %s196_s8 }
  0x30   : > { %s820_s0 = scalar_select %p91_p7, %s650_s14, %s93_s11  }
  0x31   : > { %s192_s1 = sadd.s32 %s411_s6, %s399_s5  ;;  %s181_s30 = scalar_lea.sflag [#allocation3], %s180_s28 }
  0x32   : > { %s400_s9 = sshll.u32 %s192_s1, 4  ;;  %p540_p2 = pneg %p815_p9 }
  0x33   : > { %s194_s20 = scalar_lea.hbm %s904_s2, %s400_s9  ;;  %s551_s29 = scalar_lea.vmem %s197_s8, 32 }
  0x34   : > { %p552_p11 = scmp.ne.s32.totalorder %s197_s8, %s551_s29  ;;  %s674_s21 = smov [#allocation8]  }
  0x35   : > { %s556_s4 = sshll.u32 %s674_s21, 4  ;;  %s557_s4 = int_to_ptr.vmem [resolvable:$false] %s556_s4 }
  0x36   : > { %p554_p12 = pnand %p552_p11, %p540_p2  ;;  %s558_s7 = scalar_lea.vmem %s557_s4, 64 }
  0x37   : > { %p559_p0 = scmp.lt.s32.totalorder %s197_s8, %s557_s4  ;;  %p560_p10 = scmp.lt.s32.totalorder %s558_s7, %s551_s29 }
  0x38   : > { %p555_p13 = pneg %p554_p12 }
  0x39   : > { %p561_p5 = por %p560_p10, %p559_p0 }
  0x3b   : > { %p562_p7 = pnand %p561_p5, %p555_p13 }
  0x3d   : > { %565 = shalt.err (!%p562_p7)
}
  0x3e   : > { %435 = dma.hbm_to_vmem [thread:$0]  (!%p815_p9), %s194_s20, 32, %s197_s8, %s181_s30  }
  0x3f   : > { %205 = sbr.rel (%p760_p8) target bundleno = 104 (0x68), region = 32 }
  0x44   : > { %625 = dma.done.wait (%p740_p1), [#allocation5], 16  }
  0x45   : > { %627 = vsyncadd (%p740_p1), [#allocation5], 4294967280 }
  0x46   : > { %629 = dma.done.wait (%p740_p1), [#allocation6], 16  }
  0x47   : > { %631 = vsyncadd (%p740_p1), [#allocation6], 4294967280  ;;  %s840_s1 = sand.u32 1, %s646_s13  }
  0x48   : > { %s404_s12 = sshll.u32 %s840_s1, 1  ;;  %s216_s25 = scalar_lea.sflag [#allocation3], %s840_s1 }
  0x49   : > { %s219_s26 = scalar_lea.vmem [#allocation8], %s404_s12 }
  0x4a   : > { %633 = dma.done.wait (%p750_p4), %s216_s25, 32  }
  0x4b   : > { %635 = vsyncadd (%p750_p4), %s216_s25, 4294967264 }
  0x4c   : > { %224 = sfence }
  0x4d   : > { %s243_s22 = sld [smem:[#allocation2 + %s654_s15]]  ;;  %s407_s11 = sshll.u32 %s654_s15, 1  ;;  %v245_v0 = vld [vmem:[%s219_s26] sm:$0x3]  ;;  %v250_v1 = vlaneseq }
  0x4e   : > { %s244_s9 = sld [smem:[#allocation7 + %s654_s15]]  ;;  %s412_s28 = smul.u32 6, %s658_s16 }
  0x4f   : > { %s242_s5 = scalar_lea.vmem [#allocation9], %s404_s12  ;;  %vm252_vm0 = vcmp.lt.s32.totalorder %v250_v1, 256  ;;  %s256_s20 = scalar_lea.sflag [#allocation4], %s840_s1 }
  0x50   : > { %s274_s6 = sshll.u32 %s242_s5, 4  ;;  %s270_s8 = sadd.s32 %s412_s28, %s407_s11  ;;  %s852_s6 = int_to_ptr.vmem [resolvable:$true] %s274_s6 }
  0x51   : > { %s408_s23 = sshll.u32 %s270_s8, 4  ;;  %s566_s30 = scalar_lea.vmem %s852_s6, 32 }
  0x52   : > { %s272_s16 = scalar_lea.hbm %s905_s3, %s408_s23  ;;  %p567_p1 = scmp.ne.s32.totalorder %s852_s6, %s566_s30 }
  0x53   : > { %v246_v2 = vstv %s243_s22  ;;  %s675_s29 = smov [#allocation9]  }
  0x54   : > { %v247_v3 = vsub.f32 %v245_v0, %v246_v2  ;;  %v248_v4 = vstv %s244_s9  ;;  %p568_p4 = pnand %p567_p1, %p801_p3  ;;  %s570_s21 = sshll.u32 %s675_s29, 4  ;;  %s571_s21 = int_to_ptr.vmem [resolvable:$false] %s570_s21 }
  0x55   : > { %s572_s4 = scalar_lea.vmem %s571_s21, 64  ;;  %p573_p9 = scmp.lt.s32.totalorder %s852_s6, %s571_s21 }
  0x56   : > { %v249_v5 = vmul.f32 %v248_v4, %v247_v3  ;;  %p569_p8 = pneg %p568_p4  ;;  %p574_p2 = scmp.lt.s32.totalorder %s572_s4, %s566_s30 }
  0x58   : > { %254 = vst.msk [vmem:[%s242_s5] sm:$0x3] %vm252_vm0, %v249_v5  ;;  %p575_p11 = por %p574_p2, %p573_p9 }
  0x5a   : > { %p576_p12 = pnand %p575_p11, %p569_p8 }
  0x5c   : > { %579 = shalt.err (!%p576_p12)
}
  0x5d   : > { %s580_s7 = scalar_lea.hbm %s272_s16, 32  ;;  %s584_s25 = scalar_lea.hbm %s905_s3, 192 }
  0x5e   : > { %p581_p13 = scmp.ne.s32.totalorder %s272_s16, %s580_s7  ;;  %p585_p5 = scmp.lt.s32.totalorder %s272_s16, %s905_s3 }
  0x5f   : > { %p586_p7 = scmp.lt.s32.totalorder %s584_s25, %s580_s7 }
  0x60   : > { %p582_p0 = pnand %p581_p13, %p801_p3 }
  0x61   : > { %p587_p1 = por %p586_p7, %p585_p5 }
  0x62   : > { %p583_p10 = pneg %p582_p0 }
  0x64   : > { %p588_p4 = pnand %p587_p1, %p583_p10 }
  0x66   : > { %591 = shalt.err (!%p588_p4)
}
  0x67   : > { %423 = dma.vmem_to_hbm [thread:$0]  (%p801_p3), %s852_s6, 32, %s272_s16, %s256_s20  }
  0x68 PF: > { %s925_s9 = sld [smem:[#allocation14_spill]]  ;;  %p445_p8 = scmp.ge.s32.totalorder %s670_s19, 2 }
  0x6a   : > { %p437_p9 = pnand %p445_p8, %p755_p6 }
  0x6c   : > { %p438_p2 = pneg %p437_p9 }
  0x6e   : > { %s286_s28 = sand.u32 1, %s925_s9  }
  0x6f   : > { %s287_s5 = scalar_lea.sflag [#allocation4], %s286_s28 }
  0x70   : > { %637 = dma.done.wait (%p438_p2), %s287_s5, 32  }
  0x71   : > { %639 = vsyncadd (%p438_p2), %s287_s5, 4294967264  ;;  %s21_s19 = sadd.s32 1, %s670_s19   ;;  %s927_s27 = sld [smem:[#allocation16_spill]] }
  0x72   : > { %p18_p11 = scmp.ge.s32.totalorder %s21_s19, 8   ;;  %s928_s12 = smov %s646_s13 }
  0x73   : > { %s929_s13 = smov %s650_s14  ;;  %s930_s14 = smov %s820_s0 }
  0x74   : > { %s931_s15 = smov %s662_s17  ;;  %s932_s16 = smov %s666_s18 }
  0x75   : > { %s934_s18 = smov %s940_s10  ;;  %20 = sbr.rel (!%p18_p11) target bundleno = 12 (0xc), region = 87 }
  0x77   : > { %s933_s17 = smov %s927_s27 }
  0x7a   :  { %292 = vsyncpa [#allocation3], 1 }
  0x7b   :  { %294 = vsyncpa [#allocation3 + $0x1], 1 }
  0x7c   :  { %295 = vsyncpa [#allocation4], 1 }
  0x7d   :  { %297 = vsyncpa [#allocation4 + $0x1], 1 }
  0x7e   :  { %298 = vsyncpa [#allocation5], 1 }
  0x7f   :  { %300 = vsyncpa [#allocation5 + $0x1], 1 }
  0x80   :  { %301 = vsyncpa [#allocation6], 1 }
  0x81   :  { %303 = vsyncpa [#allocation6 + $0x1], 1 }

</bundles_post_ra>
